<compile_context>
chip_gen: v5e
topology: v5e:2x2
jax: 0.10.0
libtpu: 0.0.40
codegen_flags: <defaults>
</compile_context>

<pallas_src>
import functools

import jax
import jax.numpy as jnp
import numpy as np
from jax.experimental import pallas as pl
from jax.experimental.pallas import tpu as pltpu


def _round_up(x, m):
    return ((x + m - 1) // m) * m


def _cdiv(a, b):
    return (a + b - 1) // b


def _vmem_bytes(tb, S, key_dim, value_dim, CAD, cad_chunk, S_out, V_out):
    """Rough per-step VMEM footprint estimate (bytes) used to size the batch tile."""
    bf, f = 2, 4
    c = min(cad_chunk, CAD)
    # Double-buffered pipelined inputs / outputs.
    io = 2 * (tb * key_dim * bf + tb * S * value_dim * bf
              + tb * S_out * f + tb * V_out * f)
    # Resident weights (Pallas still allocates two buffers each).
    wts = 2 * ((key_dim + value_dim) * CAD * bf + CAD * f)
    # In-kernel f32 intermediates: v_cad chunk + tanh/interaction chunk,
    # scores/softmax temporaries, f32 copy of the value tile, output slabs.
    live = (2 * tb * S * c * f
            + 2 * tb * S * f
            + tb * S * value_dim * f
            + tb * V_out * f + tb * S_out * f)
    return io + wts + live


def kea_kernel(key_ref, val_ref, wk_ref, wv_ref, wa_ref, ctx_ref, attn_ref,
               *, cad_chunk):
    TB, S, value_dim = val_ref.shape
    CAD = wk_ref.shape[1]
    S_out = attn_ref.shape[1]
    V_out = ctx_ref.shape[1]

    k = key_ref[...]                                    # (TB, key_dim)       bf16
    v = val_ref[...]                                    # (TB, S, value_dim)  bf16
    v_flat = v.reshape(TB * S, value_dim)               # tall M for the MXU
    wa = wa_ref[...]                                     # (1, CAD)            f32

    # Attention scores accumulated over CAD chunks; the (TB, S, chunk) f32
    # intermediates stay small regardless of CAD (bounded VMEM / vreg pressure).
    scores = jnp.zeros((TB, S), jnp.float32)
    for c0 in range(0, CAD, cad_chunk):                 # static trace-time loop
        c1 = min(c0 + cad_chunk, CAD)
        k_cad = jnp.dot(k, wk_ref[:, c0:c1],
                        preferred_element_type=jnp.float32)          # (TB, c)
        v_cad = jnp.dot(v_flat, wv_ref[:, c0:c1],
                        preferred_element_type=jnp.float32)          # (TB*S, c)
        inter = jnp.tanh(v_cad.reshape(TB, S, c1 - c0) + k_cad[:, None, :])
        # Score chunk: VPU multiply + lane reduce (no N=1 matmul).
        scores = scores + jnp.sum(inter * wa[:, c0:c1], axis=-1)     # (TB, S)

    # Row-wise (per-batch) softmax over the sequence axis, f32.
    m = jnp.max(scores, axis=-1, keepdims=True)                      # (TB, 1)
    e = jnp.exp(scores - m)                                          # (TB, S)
    inv = pl.reciprocal(jnp.sum(e, axis=-1, keepdims=True), approx=True)
    w = e * inv                                                      # (TB, S)

    # context_b = sum_s value[b, s, :] * w[b, s]  (f32 accumulation)
    ctx = jnp.sum(v.astype(jnp.float32) * w[:, :, None], axis=1)     # (TB, value_dim)

    # Lane-dense output slabs (last dim padded to a multiple of 128 by the
    # wrapper): zero-fill once, then write the live lanes.  The HBM writeback
    # is a dense, unmasked store; padded lanes are sliced off host-side.
    if S_out == S:
        attn_ref[...] = w
    else:
        attn_ref[...] = jnp.zeros((TB, S_out), jnp.float32)
        attn_ref[:, :S] = w
    if V_out == value_dim:
        ctx_ref[...] = ctx
    else:
        ctx_ref[...] = jnp.zeros((TB, V_out), jnp.float32)
        ctx_ref[:, :value_dim] = ctx


@functools.partial(jax.jit,
                   static_argnames=("max_tb", "cad_chunk", "vmem_budget_bytes"))
def key_event_attention(key_tensor, value_tensor, w_key, w_val, w_attn, *,
                        max_tb=256, cad_chunk=256,
                        vmem_budget_bytes=40 * 1024 * 1024):
    """key_tensor: (B, key_dim), value_tensor: (B, S, value_dim).
    w_key: (key_dim, CAD), w_val: (value_dim, CAD), w_attn: (CAD, 1).
    Returns (context (B, value_dim), attention_weights (B, S))."""
    B, key_dim = key_tensor.shape
    _, S, value_dim = value_tensor.shape
    CAD = w_key.shape[1]

    # Lane-dense output widths (multiples of 128).
    S_out = _round_up(S, 128)
    V_out = _round_up(value_dim, 128)

    # bf16 MXU feeding: cast inputs + projection weights host-side (also halves
    # the dominant HBM value stream).  Accumulation / softmax / context stay f32.
    key_bf = key_tensor.astype(jnp.bfloat16)
    val_bf = value_tensor.astype(jnp.bfloat16)
    wk_bf = w_key.astype(jnp.bfloat16)
    wv_bf = w_val.astype(jnp.bfloat16)
    wa_row = w_attn.reshape(1, CAD).astype(jnp.float32)

    # VMEM-derived batch tile: largest sublane-aligned tile under the budget.
    TB = min(_round_up(max_tb, 8), _round_up(B, 8))
    while TB > 8 and _vmem_bytes(TB, S, key_dim, value_dim, CAD, cad_chunk,
                                 S_out, V_out) > vmem_budget_bytes:
        TB = max(8, _round_up(TB // 2, 8))
    # v7x megacore: make sure the "parallel" batch axis has >= 2 grid steps so
    # both TensorCores get work (no effect on single-TC v5e/v6e correctness).
    if B > 8:
        while TB > 8 and _cdiv(B, TB) < 2:
            TB = max(8, _round_up(TB // 2, 8))

    B_pad = _round_up(B, TB)
    if B_pad != B:
        # Zero-padded batch rows: uniform softmax + zero context; sliced off below.
        key_bf = jnp.pad(key_bf, ((0, B_pad - B), (0, 0)))
        val_bf = jnp.pad(val_bf, ((0, B_pad - B), (0, 0), (0, 0)))

    grid_spec = pltpu.PrefetchScalarGridSpec(
        num_scalar_prefetch=0,
        grid=(B_pad // TB,),
        in_specs=[
            pl.BlockSpec((TB, key_dim), lambda b: (b, 0)),
            pl.BlockSpec((TB, S, value_dim), lambda b: (b, 0, 0)),
            # Weights: full-array blocks with constant index_map -> DMA'd once.
            pl.BlockSpec((key_dim, CAD), lambda b: (0, 0)),
            pl.BlockSpec((value_dim, CAD), lambda b: (0, 0)),
            pl.BlockSpec((1, CAD), lambda b: (0, 0)),
        ],
        out_specs=[
            pl.BlockSpec((TB, V_out), lambda b: (b, 0)),
            pl.BlockSpec((TB, S_out), lambda b: (b, 0)),
        ],
    )

    context, attn = pl.pallas_call(
        functools.partial(kea_kernel, cad_chunk=cad_chunk),
        out_shape=(
            jax.ShapeDtypeStruct((B_pad, V_out), jnp.float32),
            jax.ShapeDtypeStruct((B_pad, S_out), jnp.float32),
        ),
        grid_spec=grid_spec,
        compiler_params=pltpu.CompilerParams(
            dimension_semantics=("parallel",),
            vmem_limit_bytes=48 * 1024 * 1024),
    )(key_bf, val_bf, wk_bf, wv_bf, wa_row)

    return context[:B, :value_dim], attn[:B, :S]


def reference_forward(key_tensor, value_tensor, w_key, w_val, w_attn):
    k_cad = key_tensor @ w_key                              # (B, CAD)
    v_cad = jnp.einsum("bsv,vc->bsc", value_tensor, w_val)  # (B, S, CAD)
    inter = jnp.tanh(v_cad + k_cad[:, None, :])
    scores = jnp.einsum("bsc,c->bs", inter, w_attn[:, 0])
    weights = jax.nn.softmax(scores, axis=1)
    context = jnp.sum(value_tensor * weights[:, :, None], axis=1)
    return context, weights


if __name__ == "__main__":
    # Small, module-consistent shapes.
    B, S = 2, 8
    key_dim, value_dim, CAD = 32, 32, 128

    key = jax.random.PRNGKey(0)
    k0, k1, k2, k3, k4 = jax.random.split(key, 5)

    # Deterministic "PyTorch-like" Linear init: U(-1/sqrt(fan_in), 1/sqrt(fan_in)),
    # stored transposed (in, out) so the kernel computes x @ W.
    w_key = jax.random.uniform(k0, (key_dim, CAD), jnp.float32,
                               -1.0 / np.sqrt(key_dim), 1.0 / np.sqrt(key_dim))
    w_val = jax.random.uniform(k1, (value_dim, CAD), jnp.float32,
                               -1.0 / np.sqrt(value_dim), 1.0 / np.sqrt(value_dim))
    w_attn = jax.random.uniform(k2, (CAD, 1), jnp.float32,
                                -1.0 / np.sqrt(CAD), 1.0 / np.sqrt(CAD))

    key_tensor = jax.random.normal(k3, (B, key_dim), jnp.float32)
    value_tensor = jax.random.normal(k4, (B, S, value_dim), jnp.float32)

    context, attn_weights = key_event_attention(
        key_tensor, value_tensor, w_key, w_val, w_attn)
    jax.block_until_ready((context, attn_weights))

    ctx_ref, attn_ref = reference_forward(
        key_tensor, value_tensor, w_key, w_val, w_attn)

    assert context.shape == (B, value_dim)
    assert attn_weights.shape == (B, S)
    # bf16 MXU feeding + approx softmax reciprocal -> ~1e-2-level tolerance.
    np.testing.assert_allclose(np.asarray(context), np.asarray(ctx_ref),
                               rtol=2e-2, atol=2e-2)
    np.testing.assert_allclose(np.asarray(attn_weights), np.asarray(attn_ref),
                               rtol=2e-2, atol=2e-2)

    # Second check: B not a multiple of the tile, grid > 1 (B=20 -> TB=16, 2 steps,
    # 12 zero-padded batch rows exercised and sliced off), padded output lanes.
    B2 = 20
    key_tensor2 = jax.random.normal(jax.random.PRNGKey(5), (B2, key_dim), jnp.float32)
    value_tensor2 = jax.random.normal(jax.random.PRNGKey(6), (B2, S, value_dim),
                                      jnp.float32)
    ctx2, attn2 = key_event_attention(
        key_tensor2, value_tensor2, w_key, w_val, w_attn)
    jax.block_until_ready((ctx2, attn2))
    ctx2_ref, attn2_ref = reference_forward(
        key_tensor2, value_tensor2, w_key, w_val, w_attn)
    np.testing.assert_allclose(np.asarray(ctx2), np.asarray(ctx2_ref),
                               rtol=2e-2, atol=2e-2)
    np.testing.assert_allclose(np.asarray(attn2), np.asarray(attn2_ref),
                               rtol=2e-2, atol=2e-2)

    print("KERNEL_OK")
</pallas_src>

<mosaic_0001>
module attributes {stable_mosaic.version = 11 : i64} {
  func.func @kea_kernel(%arg0: i32, %arg1: memref<8x32xbf16, #tpu.memory_space<vmem>>, %arg2: memref<8x8x32xbf16, #tpu.memory_space<vmem>>, %arg3: memref<32x128xbf16, #tpu.memory_space<vmem>>, %arg4: memref<32x128xbf16, #tpu.memory_space<vmem>>, %arg5: memref<1x128xf32, #tpu.memory_space<vmem>>, %arg6: memref<8x128xf32, #tpu.memory_space<vmem>>, %arg7: memref<8x128xf32, #tpu.memory_space<vmem>>) attributes {dimension_semantics = [#tpu.dimension_semantics<parallel>], iteration_bounds = array<i64: 1>, scalar_prefetch = 0 : i64, scratch_operands = 0 : i64, tpu.core_type = #tpu.core_type<tc>, window_params = [{transform_indices = @transform_0, window_bounds = array<i64: 8, 32>}, {transform_indices = @transform_1, window_bounds = array<i64: 8, 8, 32>}, {pipeline_mode = #tpu.pipeline_mode<synchronous>, transform_indices = @transform_2, window_bounds = array<i64: 32, 128>}, {pipeline_mode = #tpu.pipeline_mode<synchronous>, transform_indices = @transform_3, window_bounds = array<i64: 32, 128>}, {pipeline_mode = #tpu.pipeline_mode<synchronous>, transform_indices = @transform_4, window_bounds = array<i64: 1, 128>}, {transform_indices = @transform_5, window_bounds = array<i64: 8, 128>}, {transform_indices = @transform_6, window_bounds = array<i64: 8, 128>}]} {
    %c0 = arith.constant 0 : index
    %c0_0 = arith.constant 0 : index
    %0 = vector.load %arg1[%c0, %c0_0] : memref<8x32xbf16, #tpu.memory_space<vmem>>, vector<8x32xbf16>
    %c0_1 = arith.constant 0 : index
    %c0_2 = arith.constant 0 : index
    %c0_3 = arith.constant 0 : index
    %1 = vector.load %arg2[%c0_1, %c0_2, %c0_3] : memref<8x8x32xbf16, #tpu.memory_space<vmem>>, vector<8x8x32xbf16>
    %2 = vector.shape_cast %1 : vector<8x8x32xbf16> to vector<64x32xbf16>
    %c0_4 = arith.constant 0 : index
    %c0_5 = arith.constant 0 : index
    %3 = vector.load %arg5[%c0_4, %c0_5] : memref<1x128xf32, #tpu.memory_space<vmem>>, vector<1x128xf32>
    %cst = arith.constant 0.000000e+00 : f32
    %4 = vector.broadcast %cst : f32 to vector<8x8xf32>
    %c0_6 = arith.constant 0 : index
    %c0_7 = arith.constant 0 : index
    %5 = vector.load %arg3[%c0_6, %c0_7] : memref<32x128xbf16, #tpu.memory_space<vmem>>, vector<32x128xbf16>
    %cst_8 = arith.constant dense<0.000000e+00> : vector<8x128xf32>
    %6 = tpu.matmul %0, %5, %cst_8 {dimension_numbers = #tpu.dot_dimension_numbers<[1], [0], [0], [1], [0, 0, 1, 1], [], []>} : vector<8x32xbf16>, vector<32x128xbf16>, vector<8x128xf32> -> vector<8x128xf32>
    %c0_9 = arith.constant 0 : index
    %c0_10 = arith.constant 0 : index
    %7 = vector.load %arg4[%c0_9, %c0_10] : memref<32x128xbf16, #tpu.memory_space<vmem>>, vector<32x128xbf16>
    %cst_11 = arith.constant dense<0.000000e+00> : vector<64x128xf32>
    %8 = tpu.matmul %2, %7, %cst_11 {dimension_numbers = #tpu.dot_dimension_numbers<[1], [0], [0], [1], [0, 0, 1, 1], [], []>} : vector<64x32xbf16>, vector<32x128xbf16>, vector<64x128xf32> -> vector<64x128xf32>
    %9 = vector.shape_cast %8 : vector<64x128xf32> to vector<8x8x128xf32>
    %10 = vector.shape_cast %6 : vector<8x128xf32> to vector<8x1x128xf32>
    %11 = vector.broadcast %10 : vector<8x1x128xf32> to vector<8x8x128xf32>
    %12 = arith.addf %9, %11 : vector<8x8x128xf32>
    %13 = math.tanh %12 : vector<8x8x128xf32>
    %14 = vector.shape_cast %3 : vector<1x128xf32> to vector<1x1x128xf32>
    %15 = vector.broadcast %14 : vector<1x1x128xf32> to vector<8x8x128xf32>
    %16 = arith.mulf %13, %15 : vector<8x8x128xf32>
    %cst_12 = arith.constant dense<0.000000e+00> : vector<8x8xf32>
    %17 = vector.multi_reduction <add>, %16, %cst_12 [2] : vector<8x8x128xf32> to vector<8x8xf32>
    %18 = arith.addf %4, %17 : vector<8x8xf32>
    %cst_13 = arith.constant dense<0xFF800000> : vector<8xf32>
    %19 = vector.multi_reduction <maximumf>, %18, %cst_13 [1] : vector<8x8xf32> to vector<8xf32>
    %20 = vector.shape_cast %19 : vector<8xf32> to vector<8x1xf32>
    %21 = vector.broadcast %20 : vector<8x1xf32> to vector<8x8xf32>
    %22 = arith.subf %18, %21 : vector<8x8xf32>
    %23 = math.exp %22 : vector<8x8xf32>
    %cst_14 = arith.constant dense<0.000000e+00> : vector<8xf32>
    %24 = vector.multi_reduction <add>, %23, %cst_14 [1] : vector<8x8xf32> to vector<8xf32>
    %25 = vector.shape_cast %24 : vector<8xf32> to vector<8x1xf32>
    %26 = tpu.reciprocal %25 {approx = true} : vector<8x1xf32> -> vector<8x1xf32>
    %27 = vector.broadcast %26 : vector<8x1xf32> to vector<8x8xf32>
    %28 = arith.mulf %23, %27 : vector<8x8xf32>
    %29 = arith.extf %1 : vector<8x8x32xbf16> to vector<8x8x32xf32>
    %30 = vector.shape_cast %28 : vector<8x8xf32> to vector<8x8x1xf32>
    %31 = vector.broadcast %30 : vector<8x8x1xf32> to vector<8x8x32xf32>
    %32 = arith.mulf %29, %31 : vector<8x8x32xf32>
    %cst_15 = arith.constant dense<0.000000e+00> : vector<8x32xf32>
    %33 = vector.multi_reduction <add>, %32, %cst_15 [1] : vector<8x8x32xf32> to vector<8x32xf32>
    %cst_16 = arith.constant 0.000000e+00 : f32
    %34 = vector.broadcast %cst_16 : f32 to vector<8x128xf32>
    %c0_17 = arith.constant 0 : index
    %c0_18 = arith.constant 0 : index
    %35 = vector.load %arg7[%c0_17, %c0_18] : memref<8x128xf32, #tpu.memory_space<vmem>>, vector<8x128xf32>
    tpu.vector_store %arg7[%c0_17, %c0_18], %34 {strides = array<i32>} : memref<8x128xf32, #tpu.memory_space<vmem>>, vector<8x128xf32>,
    %c0_19 = arith.constant 0 : index
    %c0_20 = arith.constant 0 : index
    %36 = vector.load %arg7[%c0_19, %c0_20] : memref<8x128xf32, #tpu.memory_space<vmem>>, vector<8x8xf32>
    tpu.vector_store %arg7[%c0_19, %c0_20], %28 {strides = array<i32>} : memref<8x128xf32, #tpu.memory_space<vmem>>, vector<8x8xf32>,
    %cst_21 = arith.constant 0.000000e+00 : f32
    %37 = vector.broadcast %cst_21 : f32 to vector<8x128xf32>
    %c0_22 = arith.constant 0 : index
    %c0_23 = arith.constant 0 : index
    %38 = vector.load %arg6[%c0_22, %c0_23] : memref<8x128xf32, #tpu.memory_space<vmem>>, vector<8x128xf32>
    tpu.vector_store %arg6[%c0_22, %c0_23], %37 {strides = array<i32>} : memref<8x128xf32, #tpu.memory_space<vmem>>, vector<8x128xf32>,
    %c0_24 = arith.constant 0 : index
    %c0_25 = arith.constant 0 : index
    %39 = vector.load %arg6[%c0_24, %c0_25] : memref<8x128xf32, #tpu.memory_space<vmem>>, vector<8x32xf32>
    tpu.vector_store %arg6[%c0_24, %c0_25], %33 {strides = array<i32>} : memref<8x128xf32, #tpu.memory_space<vmem>>, vector<8x32xf32>,
    return
  }
  func.func @transform_0(%arg0: i32) -> (i32, i32) {
    %c0_i32 = arith.constant 0 : i32
    %c0_i32_0 = arith.constant 0 : i32
    return %arg0, %c0_i32 : i32, i32
  }
  func.func @transform_1(%arg0: i32) -> (i32, i32, i32) {
    %c0_i32 = arith.constant 0 : i32
    %c0_i32_0 = arith.constant 0 : i32
    %c0_i32_1 = arith.constant 0 : i32
    return %arg0, %c0_i32, %c0_i32_0 : i32, i32, i32
  }
  func.func @transform_2(%arg0: i32) -> (i32, i32) {
    %c0_i32 = arith.constant 0 : i32
    %c0_i32_0 = arith.constant 0 : i32
    %c0_i32_1 = arith.constant 0 : i32
    return %c0_i32, %c0_i32_0 : i32, i32
  }
  func.func @transform_3(%arg0: i32) -> (i32, i32) {
    %c0_i32 = arith.constant 0 : i32
    %c0_i32_0 = arith.constant 0 : i32
    %c0_i32_1 = arith.constant 0 : i32
    return %c0_i32, %c0_i32_0 : i32, i32
  }
  func.func @transform_4(%arg0: i32) -> (i32, i32) {
    %c0_i32 = arith.constant 0 : i32
    %c0_i32_0 = arith.constant 0 : i32
    %c0_i32_1 = arith.constant 0 : i32
    return %c0_i32, %c0_i32_0 : i32, i32
  }
  func.func @transform_5(%arg0: i32) -> (i32, i32) {
    %c0_i32 = arith.constant 0 : i32
    %c0_i32_0 = arith.constant 0 : i32
    return %arg0, %c0_i32 : i32, i32
  }
  func.func @transform_6(%arg0: i32) -> (i32, i32) {
    %c0_i32 = arith.constant 0 : i32
    %c0_i32_0 = arith.constant 0 : i32
    return %arg0, %c0_i32 : i32, i32
  }
}

</mosaic_0001>

<bundles_post_ra>
// kernel: key_event_attention.1
= control target key start
LH: loop header
LB: loop body
LE: loop exit
PB: predicated region body
PF: predicated region fallthrough
CT: control target
= control target key end

     0   :  { %vm49_vm0 = vcmask 261120   ;;  %v226_v61 = vlaneseq  ;;  %vm236_vm1 = vcmask 1041409   ;;  %vm238_vm2 = vcmask 1042434   ;;  %s790_s2 = inlined_call_operand.vmem [shape: bf16[32,128], index: 2, kind: input, shape index: {}]   ;;  %s791_s3 = inlined_call_operand.vmem [shape: bf16[32,128], index: 3, kind: input, shape index: {}]   ;;  %s792_s1 = inlined_call_operand.vmem [shape: bf16[8,8,32], index: 1, kind: input, shape index: {}]   ;;  %s793_s0 = inlined_call_operand.vmem [shape: bf16[8,32], index: 0, kind: input, shape index: {}]   ;;  %s794_s4 = inlined_call_operand.vmem [shape: f32[1,128], index: 4, kind: input, shape index: {}]   ;;  %s795_s6 = inlined_call_operand.vmem [shape: f32[8,128], index: 6, kind: output, shape index: {1}]   ;;  %s796_s5 = inlined_call_operand.vmem [shape: f32[8,128], index: 5, kind: output, shape index: {0}]  }
   0x1   :  { %v571_v0 = vld [vmem:[%s790_s2 + $0x8] sm:$0xff]  ;;  %v570_v2 = vld [vmem:[%s790_s2] sm:$0xff]  ;;  %v569_v7 = vld [vmem:[%s792_s1 + $0x18] sm:$0xff]  ;;  %vm240_vm3 = vcmask 1043459   ;;  %vm242_vm4 = vcmask 1044484   ;;  %vm244_vm5 = vcmask 1045509  }
   0x2   :  { %v573_v1 = vld [vmem:[%s791_s3 + $0x8] sm:$0xff]  ;;  %59 = vmatpush.bf16.msra.mxu0 %v571_v0  ;;  %v572_v3 = vld [vmem:[%s791_s3] sm:$0xff]  ;;  %v568_v8 = vld [vmem:[%s792_s1 + $0x10] sm:$0xff]  ;;  %v690_v0 = vand.u32 127, %v226_v61  ;;  %vm246_vm6 = vcmask 1046534   ;;  %vm248_vm7 = vcmask 1047559  }
   0x3   :  { %574 = vmatpush.bf16.msra.mxu2 %v573_v1  ;;  %120 = vmatpush.bf16.msra.mxu1 %v573_v1  ;;  %v567_v4 = vld [vmem:[%s792_s1 + $0x8] sm:$0xff]  ;;  %v23_v5 = vld [vmem:[%s793_s0] sm:$0xf]  ;;  %vm251_vm8 = vcmask 64512  }
   0x4   :  { %575 = vmatpush.bf16.msra.mxu3 %v573_v1  ;;  %v566_v6 = vld [vmem:[%s792_s1] sm:$0xff] }
   0x5   :  { %v583_v23 = vld [vmem:[%s794_s4] ss:$0 sm:$0xff] }
   0x6   :  { %60 = vmatpush.bf16.msra.mxu0 %v570_v2 }
   0x7   :  { %576 = vmatpush.bf16.msra.mxu2 %v572_v3  ;;  %121 = vmatpush.bf16.msra.mxu1 %v572_v3 }
   0x8   :  { %577 = vmatpush.bf16.msra.mxu3 %v572_v3 }
   0x9   :  { %537 = vmatmul.msk.bf16.vlgmr.msra.gmra.mxu0 %vm49_vm0, %v23_v5 }
   0xa   :  { %563 = vmatmul.msk.bf16.vlgmr.msra.gmra.mxu2 %vm49_vm0, %v567_v4  ;;  %562 = vmatmul.msk.bf16.vlgmr.msra.gmra.mxu1 %vm49_vm0, %v566_v6 }
   0xb   :  { %565 = vmatmul.msk.bf16.vlgmr.msra.gmra.mxu3 %vm49_vm0, %v569_v7 }
  0x1a   :  { %564 = vmatmul.msk.bf16.gmra.mxu2 %vm49_vm0, %v568_v8 }
  0x86   :  { %v62_v9 = vpop.f32.mrf.mxu0 }
  0x87   :  { %v123_v10 = vpop.f32.mrf.mxu1  ;;  %v151_v11 = vperm.slane %v62_v9, 0  ;;  %v145_v12 = vrot.slane %v62_v9, 2  ;;  %v144_v13 = vrot.slane %v62_v9, 1  ;;  %v149_v20 = vrot.slane %v62_v9, 6 }
  0x88   :  { %v146_v21 = vrot.slane %v62_v9, 3  ;;  %v150_v29 = vrot.slane %v62_v9, 7  ;;  %v147_v38 = vrot.slane %v62_v9, 4  ;;  %v148_v48 = vrot.slane %v62_v9, 5 }
  0x89   :  { %v167_v14 = vadd.f32 %v151_v11, %v123_v10  ;;  %v153_v15 = vperm.slane %v145_v12, 0  ;;  %v152_v17 = vperm.slane %v144_v13, 0  ;;  %v157_v27 = vperm.slane %v149_v20, 0 }
  0x8a   :  { %v154_v28 = vperm.slane %v146_v21, 0  ;;  %v158_v35 = vperm.slane %v150_v29, 0  ;;  %v155_v42 = vperm.slane %v147_v38, 0  ;;  %v156_v51 = vperm.slane %v148_v48, 0 }
  0x8b   :  { %584 = vtanh.f32 %v167_v14  ;;  %v618_v21 = vmov 0  }
  0x8c   :  { %582 = vset.pattern.permute.xlu2 %v618_v21  ;;  %581 = vset.pattern.permute.xlu1 %v618_v21 }
  0x8d   :  { %v128_v16 = vpop.f32.mrf.mxu2  ;;  %580 = vset.pattern.permute.xlu0 %v618_v21 }
  0x8e   :  { %v169_v18 = vadd.f32 %v153_v15, %v128_v16  ;;  %v138_v19 = vpop.f32.mrf.mxu3  ;;  %v64_v22 = vpop.f32.mrf.mxu0 }
  0x8f   :  { %v125_v24 = vpop.f32.mrf.mxu1  ;;  %v173_v33 = vadd.f32 %v157_v27, %v138_v19 }
  0x90   :  { %586 = vtanh.f32 %v169_v18  ;;  %v168_v25 = vadd.f32 %v152_v17, %v125_v24 }
  0x91   :  { %v585_v26 = vpop.eup %584 }
  0x92   :  { %588 = vtanh.f32 %v168_v25  ;;  %v186_v30 = vmul.f32 %v585_v26, %v583_v23 }
  0x94   :  { %194 = vadd.xlane.f32.xlu0 %v186_v30 }
  0x95   :  { %v130_v31 = vpop.f32.mrf.mxu2 }
  0x96   :  { %v587_v32 = vpop.eup %586  ;;  %v170_v34 = vadd.f32 %v154_v28, %v130_v31  ;;  %v140_v36 = vpop.f32.mrf.mxu3 }
  0x97   :  { %v188_v37 = vmul.f32 %v587_v32, %v583_v23  ;;  %v174_v40 = vadd.f32 %v158_v35, %v140_v36 }
  0x98   :  { %590 = vtanh.f32 %v170_v34  ;;  %v589_v39 = vpop.eup %588 }
  0x99   :  { %198 = vadd.xlane.f32.xlu1 %v188_v37  ;;  %592 = vtanh.f32 %v173_v33  ;;  %v187_v41 = vmul.f32 %v589_v39, %v583_v23 }
  0x9a   :  { %594 = vtanh.f32 %v174_v40 }
  0x9c   :  { %196 = vadd.xlane.f32.xlu0 %v187_v41 }
  0x9d   :  { %v133_v43 = vpop.f32.mrf.mxu2 }
  0x9e   :  { %v591_v44 = vpop.eup %590  ;;  %v171_v45 = vadd.f32 %v155_v42, %v133_v43 }
  0x9f   :  { %v189_v46 = vmul.f32 %v591_v44, %v583_v23  ;;  %v593_v47 = vpop.eup %592 }
  0xa0   :  { %596 = vtanh.f32 %v171_v45  ;;  %v192_v49 = vmul.f32 %v593_v47, %v583_v23  ;;  %v595_v50 = vpop.eup %594 }
  0xa1   :  { %200 = vadd.xlane.f32.xlu1 %v189_v46  ;;  %v193_v56 = vmul.f32 %v595_v50, %v583_v23 }
  0xa4   :  { %206 = vadd.xlane.f32.xlu0 %v192_v49 }
  0xa5   :  { %v135_v52 = vpop.f32.mrf.mxu2 }
  0xa6   :  { %v597_v53 = vpop.eup %596  ;;  %v172_v54 = vadd.f32 %v156_v51, %v135_v52 }
  0xa7   :  { %v190_v55 = vmul.f32 %v597_v53, %v583_v23 }
  0xa8   :  { %598 = vtanh.f32 %v172_v54 }
  0xa9   :  { %202 = vadd.xlane.f32.xlu2 %v190_v55  ;;  %208 = vadd.xlane.f32.xlu1 %v193_v56 }
  0xae   :  { %v599_v57 = vpop.eup %598 }
  0xaf   :  { %v191_v58 = vmul.f32 %v599_v57, %v583_v23 }
  0xb1   :  { %204 = vadd.xlane.f32.xlu2 %v191_v58 }
 0x107   :  { %v195_v59 = vpop.xlane.xlu0 %194 }
 0x108   :  { %v228_v2 = vperm.slane %v195_v59, %v690_v0 }
 0x10c   :  { %v199_v60 = vpop.xlane.xlu1 %198 }
 0x10d   :  { %v230_v6 = vperm.slane %v199_v60, %v690_v0 }
 0x10f   :  { %v197_v62 = vpop.xlane.xlu0 %196 }
 0x110   :  { %v229_v3 = vperm.slane %v197_v62, %v690_v0 }
 0x112   :  { %v237_v4 = vsel %vm236_vm1, %v229_v3, %v228_v2 }
 0x113   :  { %v239_v9 = vsel %vm238_vm2, %v230_v6, %v237_v4 }
 0x114   :  { %v201_v63 = vpop.xlane.xlu1 %200 }
 0x115   :  { %v231_v5 = vperm.slane %v201_v63, %v690_v0 }
 0x117   :  { %v207_v8 = vpop.xlane.xlu0 %206  ;;  %v241_v12 = vsel %vm240_vm3, %v231_v5, %v239_v9 }
 0x118   :  { %v234_v14 = vperm.slane %v207_v8, %v690_v0 }
 0x11c   :  { %v203_v1 = vpop.xlane.xlu2 %202  ;;  %v209_v10 = vpop.xlane.xlu1 %208 }
 0x11d   :  { %v232_v7 = vperm.slane %v203_v1, %v690_v0  ;;  %v235_v16 = vperm.slane %v209_v10, %v690_v0 }
 0x11f   :  { %v243_v15 = vsel %vm242_vm4, %v232_v7, %v241_v12 }
 0x124   :  { %v205_v11 = vpop.xlane.xlu2 %204 }
 0x125   :  { %v233_v13 = vperm.slane %v205_v11, %v690_v0 }
 0x127   :  { %v245_v17 = vsel %vm244_vm5, %v233_v13, %v243_v15 }
 0x128   :  { %v247_v18 = vsel %vm246_vm6, %v234_v14, %v245_v17 }
 0x129   :  { %v249_v19 = vsel %vm248_vm7, %v235_v16, %v247_v18 }
 0x12a   :  { %v252_v20 = vsel %vm251_vm8, %v249_v19, -inf }
 0x12b   :  { %253 = vmax.xlane.f32.xlu2 %v252_v20 }
 0x19e   :  { %v254_v22 = vpop.xlane.xlu2 %253 }
 0x19f   :  { %v258_v23 = vperm.slane %v254_v22, 2  ;;  %v257_v24 = vperm.slane %v254_v22, 1  ;;  %v256_v25 = vperm.slane %v254_v22, 0  ;;  %v259_v29 = vperm.slane %v254_v22, 3 }
 0x1a0   :  { %v260_v30 = vperm.slane %v254_v22, 4  ;;  %v263_v31 = vperm.slane %v254_v22, 7  ;;  %v261_v39 = vperm.slane %v254_v22, 5  ;;  %v262_v41 = vperm.slane %v254_v22, 6 }
 0x1a1   :  { %v274_v26 = vsub.f32 %v199_v60, %v258_v23  ;;  %v273_v27 = vsub.f32 %v197_v62, %v257_v24  ;;  %v272_v28 = vsub.f32 %v195_v59, %v256_v25  ;;  %v275_v35 = vsub.f32 %v201_v63, %v259_v29 }
 0x1a2   :  { %v276_v36 = vsub.f32 %v203_v1, %v260_v30  ;;  %v279_v37 = vsub.f32 %v209_v10, %v263_v31  ;;  %v277_v46 = vsub.f32 %v205_v11, %v261_v39  ;;  %v278_v47 = vsub.f32 %v207_v8, %v262_v41 }
 0x1a3   :  { %v284_v32 = vmul.f32 1.442695, %v274_v26  ;;  %v282_v33 = vmul.f32 1.442695, %v273_v27  ;;  %v280_v34 = vmul.f32 1.442695, %v272_v28 }
 0x1a4   :  { %v286_v38 = vmul.f32 1.442695, %v275_v35  ;;  %v288_v40 = vmul.f32 1.442695, %v276_v36  ;;  %v294_v43 = vmul.f32 1.442695, %v279_v37 }
 0x1a5   :  { %600 = vpow2.f32 %v284_v32  ;;  %v290_v48 = vmul.f32 1.442695, %v277_v46  ;;  %v292_v49 = vmul.f32 1.442695, %v278_v47  ;;  %v24_v35 = vld [vmem:[%s792_s1] sm:$0xf] }
 0x1a6   :  { %602 = vpow2.f32 %v282_v33  ;;  %v373_v37 = vunpack.c.l.bf16 %v24_v35 }
 0x1a7   :  { %604 = vpow2.f32 %v280_v34  ;;  %v25_v34 = vld [vmem:[%s792_s1 + $0x4] sm:$0xff]  }
 0x1a8   :  { %606 = vpow2.f32 %v286_v38  ;;  %v374_v36 = vunpack.c.l.bf16 %v25_v34 }
 0x1a9   :  { %608 = vpow2.f32 %v288_v40 }
 0x1aa   :  { %610 = vpow2.f32 %v294_v43 }
 0x1ab   :  { %v708_v42 = vpop.eup %600  ;;  %612 = vpow2.f32 %v290_v48 }
 0x1ac   :  { %v603_v44 = vpop.eup %602  ;;  %311 = vperm.xlu2 %582, %v708_v42   ;;  %614 = vpow2.f32 %v292_v49  ;;  %v375_v49 = vunpack.c.h.bf16 %v25_v34 }
 0x1ad   :  { %v605_v45 = vpop.eup %604  ;;  %308 = vperm.xlu1 %581, %v603_v44  }
 0x1ae   :  { %305 = vperm.xlu0 %580, %v605_v45   ;;  %v607_v50 = vpop.eup %606 }
 0x1af   :  { %v609_v51 = vpop.eup %608 }
 0x1b0   :  { %v611_v52 = vpop.eup %610 }
 0x1b1   :  { %v613_v53 = vpop.eup %612 }
 0x1b2   :  { %v615_v54 = vpop.eup %614 }
 0x1b4   :  { %314 = vperm.xlu2 %582, %v607_v50  }
 0x1b5   :  { %317 = vperm.xlu1 %581, %v609_v51  }
 0x1b6   :  { %326 = vperm.xlu0 %580, %v611_v52  }
 0x1bc   :  { %320 = vperm.xlu2 %582, %v613_v53  }
 0x1bd   :  { %323 = vperm.xlu1 %581, %v615_v54  }
 0x206   :  { %v312_v55 = vpop.permute.xlu2 %311 }
 0x207   :  { %v330_v63 = vperm.slane %v312_v55, %v690_v0 }
 0x20e   :  { %v315_v58 = vpop.permute.xlu2 %314 }
 0x20f   :  { %v331_v3 = vperm.slane %v315_v58, %v690_v0 }
 0x216   :  { %v321_v4 = vpop.permute.xlu2 %320 }
 0x217   :  { %v333_v8 = vperm.slane %v321_v4, %v690_v0 }
 0x21f   :  { %v309_v56 = vpop.permute.xlu1 %308 }
 0x220   :  { %v306_v57 = vpop.permute.xlu0 %305  ;;  %v329_v59 = vperm.slane %v309_v56, %v690_v0  ;;  %v29_v56 = vld [vmem:[%s792_s1 + $0x14] sm:$0xf] }
 0x221   :  { %v328_v60 = vperm.slane %v306_v57, %v690_v0 }
 0x223   :  { %v336_v61 = vsel %vm236_vm1, %v329_v59, %v328_v60 }
 0x224   :  { %v337_v1 = vsel %vm238_vm2, %v330_v63, %v336_v61 }
 0x225   :  { %v338_v5 = vsel %vm240_vm3, %v331_v3, %v337_v1 }
 0x227   :  { %v318_v62 = vpop.permute.xlu1 %317 }
 0x228   :  { %v332_v2 = vperm.slane %v318_v62, %v690_v0  ;;  %v327_v7 = vpop.permute.xlu0 %326 }
 0x229   :  { %v335_v11 = vperm.slane %v327_v7, %v690_v0 }
 0x22a   :  { %v339_v6 = vsel %vm242_vm4, %v332_v2, %v338_v5  ;;  %v378_v2 = vunpack.c.l.bf16 %v29_v56 }
 0x22b   :  { %v340_v12 = vsel %vm244_vm5, %v333_v8, %v339_v6 }
 0x22f   :  { %v324_v9 = vpop.permute.xlu1 %323 }
 0x230   :  { %v334_v10 = vperm.slane %v324_v9, %v690_v0 }
 0x232   :  { %v341_v13 = vsel %vm246_vm6, %v334_v10, %v340_v12 }
 0x233   :  { %v342_v14 = vsel %vm248_vm7, %v335_v11, %v341_v13 }
 0x234   :  { %v344_v15 = vsel %vm251_vm8, %v342_v14, 0.0 }
 0x235   :  { %345 = vadd.xlane.f32.xlu2 %v344_v15 }
 0x2a8   :  { %v346_v16 = vpop.xlane.xlu2 %345 }
 0x2a9   :  { %616 = vrcp.f32 %v346_v16  ;;  %v31_v16 = vld [vmem:[%s792_s1 + $0x1c] sm:$0xf] }
 0x2af   :  { %v617_v17 = vpop.eup %616 }
 0x2b0   :  { %v350_v18 = vperm.slane %v617_v17, 1  ;;  %v349_v19 = vperm.slane %v617_v17, 0  ;;  %v352_v22 = vperm.slane %v617_v17, 3  ;;  %v351_v23 = vperm.slane %v617_v17, 2 }
 0x2b1   :  { %v354_v26 = vperm.slane %v617_v17, 5  ;;  %v353_v27 = vperm.slane %v617_v17, 4  ;;  %v356_v30 = vperm.slane %v617_v17, 7  ;;  %v355_v31 = vperm.slane %v617_v17, 6 }
 0x2b2   :  { %v366_v20 = vmul.f32 %v603_v44, %v350_v18  ;;  %v365_v21 = vmul.f32 %v605_v45, %v349_v19  ;;  %v368_v24 = vmul.f32 %v607_v50, %v352_v22  ;;  %v367_v25 = vmul.f32 %v708_v42, %v351_v23  ;;  %v27_v42 = vld [vmem:[%s792_s1 + $0xc] sm:$0xff]   ;;  %v30_v19 = vld [vmem:[%s792_s1 + $0x18] sm:$0xf] }
 0x2b3   :  { %v370_v28 = vmul.f32 %v613_v53, %v354_v26  ;;  %v369_v29 = vmul.f32 %v609_v51, %v353_v27  ;;  %v372_v32 = vmul.f32 %v611_v52, %v356_v30  ;;  %v371_v33 = vmul.f32 %v615_v54, %v355_v31 }
 0x2b4   :  { %388 = vperm.xlu0 %580, %v366_v20   ;;  %383 = vperm.xlu1 %581, %v365_v21   ;;  %v619_v45 = vmov 0.0   ;;  %v376_v48 = vunpack.c.l.bf16 %v27_v42  ;;  %v377_v3 = vunpack.c.h.bf16 %v27_v42  ;;  %v380_v26 = vunpack.c.l.bf16 %v31_v16 }
 0x2b5   :  { %485 = vst [vmem:[%s795_s6] sm:$0xff] %v619_v45  ;;  %v379_v30 = vunpack.c.l.bf16 %v30_v19 }
 0x2b6   :  { %503 = vst [vmem:[%s796_s5] sm:$0xff] %v619_v45 }
 0x2bc   :  { %398 = vperm.xlu0 %580, %v368_v24   ;;  %393 = vperm.xlu1 %581, %v367_v25  }
 0x2c4   :  { %408 = vperm.xlu0 %580, %v370_v28   ;;  %403 = vperm.xlu1 %581, %v369_v29  }
 0x2cc   :  { %418 = vperm.xlu0 %580, %v372_v32   ;;  %413 = vperm.xlu1 %581, %v371_v33  }
 0x326   :  { %v389_v38 = vpop.permute.xlu0 %388  ;;  %v384_v39 = vpop.permute.xlu1 %383 }
 0x327   :  { %v422_v40 = vmul.f32 %v389_v38, %v374_v36  ;;  %v421_v41 = vmul.f32 %v384_v39, %v373_v37  ;;  %v487_v59 = vperm.slane %v389_v38, %v690_v0  ;;  %v486_v60 = vperm.slane %v384_v39, %v690_v0 }
 0x329   :  { %v436_v43 = vsel %vm49_vm0, %v422_v40, 0.0  ;;  %v429_v44 = vsel %vm49_vm0, %v421_v41, 0.0  ;;  %v494_v7 = vsel %vm236_vm1, %v487_v59, %v486_v60 }
 0x32a   :  { %v437_v46 = vrot.slane %v436_v43, 4  ;;  %v430_v47 = vrot.slane %v429_v44, 4 }
 0x32c   :  { %v438_v52 = vadd.f32 %v437_v46, %v436_v43  ;;  %v431_v53 = vadd.f32 %v430_v47, %v429_v44 }
 0x32e   :  { %v399_v50 = vpop.permute.xlu0 %398  ;;  %v394_v51 = vpop.permute.xlu1 %393  ;;  %v439_v63 = vrot.slane %v438_v52, 2  ;;  %v432_v1 = vrot.slane %v431_v53, 2 }
 0x32f   :  { %v424_v54 = vmul.f32 %v399_v50, %v376_v48  ;;  %v423_v55 = vmul.f32 %v394_v51, %v375_v49  ;;  %v488_v6 = vperm.slane %v394_v51, %v690_v0  ;;  %v489_v8 = vperm.slane %v399_v50, %v690_v0 }
 0x330   :  { %v440_v12 = vadd.f32 %v439_v63, %v438_v52  ;;  %v433_v13 = vadd.f32 %v432_v1, %v431_v53 }
 0x331   :  { %v450_v57 = vsel %vm49_vm0, %v424_v54, 0.0  ;;  %v443_v58 = vsel %vm49_vm0, %v423_v55, 0.0  ;;  %v495_v18 = vsel %vm238_vm2, %v488_v6, %v494_v7 }
 0x332   :  { %v451_v61 = vrot.slane %v450_v57, 4  ;;  %v444_v62 = vrot.slane %v443_v58, 4  ;;  %v441_v27 = vrot.slane %v440_v12, 1  ;;  %v434_v28 = vrot.slane %v433_v13, 1 }
 0x333   :  { %v496_v29 = vsel %vm240_vm3, %v489_v8, %v495_v18 }
 0x334   :  { %v452_v4 = vadd.f32 %v451_v61, %v450_v57  ;;  %v445_v5 = vadd.f32 %v444_v62, %v443_v58  ;;  %v442_v41 = vadd.f32 %v441_v27, %v440_v12  ;;  %v435_v42 = vadd.f32 %v434_v28, %v433_v13 }
 0x336   :  { %v446_v9 = vrot.slane %v445_v5, 2  ;;  %v409_v10 = vpop.permute.xlu0 %408  ;;  %v404_v11 = vpop.permute.xlu1 %403  ;;  %v453_v17 = vrot.slane %v452_v4, 2  ;;  %v512_v60 = vsel %vm236_vm1, %v442_v41, %v435_v42 }
 0x337   :  { %v426_v14 = vmul.f32 %v409_v10, %v378_v2  ;;  %v425_v15 = vmul.f32 %v404_v11, %v377_v3  ;;  %v490_v22 = vperm.slane %v404_v11, %v690_v0  ;;  %v491_v33 = vperm.slane %v409_v10, %v690_v0 }
 0x338   :  { %v447_v23 = vadd.f32 %v446_v9, %v445_v5  ;;  %v454_v31 = vadd.f32 %v453_v17, %v452_v4 }
 0x339   :  { %v464_v20 = vsel %vm49_vm0, %v426_v14, 0.0  ;;  %v457_v21 = vsel %vm49_vm0, %v425_v15, 0.0  ;;  %v497_v35 = vsel %vm242_vm4, %v490_v22, %v496_v29 }
 0x33a   :  { %v465_v24 = vrot.slane %v464_v20, 4  ;;  %v458_v25 = vrot.slane %v457_v21, 4  ;;  %v448_v36 = vrot.slane %v447_v23, 1  ;;  %v455_v45 = vrot.slane %v454_v31, 1 }
 0x33b   :  { %v498_v47 = vsel %vm244_vm5, %v491_v33, %v497_v35 }
 0x33c   :  { %v466_v32 = vadd.f32 %v465_v24, %v464_v20  ;;  %v459_v34 = vadd.f32 %v458_v25, %v457_v21  ;;  %v449_v53 = vadd.f32 %v448_v36, %v447_v23  ;;  %v456_v61 = vadd.f32 %v455_v45, %v454_v31 }
 0x33e   :  { %v467_v37 = vrot.slane %v466_v32, 2  ;;  %v460_v38 = vrot.slane %v459_v34, 2  ;;  %v419_v39 = vpop.permute.xlu0 %418  ;;  %v414_v40 = vpop.permute.xlu1 %413  ;;  %v513_v1 = vsel %vm238_vm2, %v449_v53, %v512_v60 }
 0x33f   :  { %v428_v43 = vmul.f32 %v419_v39, %v380_v26  ;;  %v427_v44 = vmul.f32 %v414_v40, %v379_v30  ;;  %v492_v48 = vperm.slane %v414_v40, %v690_v0  ;;  %v493_v51 = vperm.slane %v419_v39, %v690_v0 }
 0x340   :  { %v461_v46 = vadd.f32 %v460_v38, %v459_v34  ;;  %v468_v49 = vadd.f32 %v467_v37, %v466_v32  ;;  %v514_v7 = vsel %vm240_vm3, %v456_v61, %v513_v1 }
 0x341   :  { %v478_v50 = vsel %vm49_vm0, %v428_v43, 0.0  ;;  %v471_v52 = vsel %vm49_vm0, %v427_v44, 0.0  ;;  %v499_v57 = vsel %vm246_vm6, %v492_v48, %v498_v47 }
 0x342   :  { %v462_v54 = vrot.slane %v461_v46, 1  ;;  %v479_v55 = vrot.slane %v478_v50, 4  ;;  %v472_v56 = vrot.slane %v471_v52, 4  ;;  %v469_v62 = vrot.slane %v468_v49, 1 }
 0x343   :  { %v500_v63 = vsel %vm248_vm7, %v493_v51, %v499_v57 }
 0x344   :  { %v480_v58 = vadd.f32 %v479_v55, %v478_v50  ;;  %v473_v59 = vadd.f32 %v472_v56, %v471_v52  ;;  %v463_v2 = vadd.f32 %v462_v54, %v461_v46  ;;  %502 = vst.msk [vmem:[%s795_s6] sm:$0xff] %vm251_vm8, %v500_v63  ;;  %v470_v6 = vadd.f32 %v469_v62, %v468_v49 }
 0x346   :  { %v481_v0 = vrot.slane %v480_v58, 2  ;;  %v474_v3 = vrot.slane %v473_v59, 2  ;;  %v515_v8 = vsel %vm242_vm4, %v463_v2, %v514_v7 }
 0x347   :  { %v516_v13 = vsel %vm244_vm5, %v470_v6, %v515_v8 }
 0x348   :  { %v482_v4 = vadd.f32 %v481_v0, %v480_v58  ;;  %v475_v5 = vadd.f32 %v474_v3, %v473_v59 }
 0x34a   :  { %v483_v9 = vrot.slane %v482_v4, 1  ;;  %v476_v10 = vrot.slane %v475_v5, 1 }
 0x34c   :  { %v484_v11 = vadd.f32 %v483_v9, %v482_v4  ;;  %v477_v12 = vadd.f32 %v476_v10, %v475_v5 }
 0x34e   :  { %v517_v14 = vsel %vm246_vm6, %v477_v12, %v516_v13 }
 0x34f   :  { %v518_v15 = vsel %vm248_vm7, %v484_v11, %v517_v14 }
 0x350   :  { %520 = vst.msk [vmem:[%s796_s5] sm:$0xff] %vm49_vm0, %v518_v15 }

</bundles_post_ra>
